<compile_context>
chip_gen: v7x
topology: tpu7x:2x2x1
jax: 0.10.0
libtpu: 0.0.40
codegen_flags: <defaults>
</compile_context>

<pallas_src>
import functools

import jax
import jax.numpy as jnp
from jax import lax
from jax.experimental import pallas as pl
from jax.experimental.pallas import tpu as pltpu


def _round_up(v: int, m: int) -> int:
    return ((v + m - 1) // m) * m


def _vmem_capacity_bytes() -> int:
    try:
        info = pltpu.get_tpu_info()
        cap = getattr(info, "vmem_capacity_bytes", None)
        if cap:
            return int(cap)
    except Exception:
        pass
    return 64 << 20  # conservative default (v7x per-TensorCore VMEM)


# --------------------------------------------------------------------------
# Kernels
# --------------------------------------------------------------------------

def _embed_norm_kernel(e_ref, o_ref, *, eps, inv_d):
    """RMS-normalize an embedding row tile to bf16 (scale is folded into x)."""
    e32 = e_ref[...].astype(jnp.float32)
    ms = jnp.sum(e32 * e32, axis=-1, keepdims=True) * inv_d
    o_ref[...] = (e32 * lax.rsqrt(ms + eps)).astype(jnp.bfloat16)


def _logits_kernel(x_ref, s_ref, e_ref, o_ref, xn_ref, *,
                   eps, inv_d, normalize_emb):
    """Hoisted x-RMSNorm + bf16 MXU matmul against the (normalized) embedding.

    x_ref : (tm, d)  activation tile (original dtype)
    s_ref : (1, d)   combined scale (1+wf)*(1+we), f32
    e_ref : (tv, d)  embedding tile (raw if normalize_emb else pre-normed bf16)
    o_ref : (tm, tv) logits tile
    xn_ref: (tm, d)  bf16 VMEM scratch caching the normalized+scaled x tile
    """
    # x-norm once per row tile (vocab axis is innermost and "arbitrary").
    @pl.when(pl.program_id(1) == 0)
    def _():
        x32 = x_ref[...].astype(jnp.float32)
        ms = jnp.sum(x32 * x32, axis=-1, keepdims=True) * inv_d
        xn_ref[...] = (x32 * lax.rsqrt(ms + eps) * s_ref[...]).astype(jnp.bfloat16)

    if normalize_emb:
        e32 = e_ref[...].astype(jnp.float32)
        ems = jnp.sum(e32 * e32, axis=-1, keepdims=True) * inv_d
        e = (e32 * lax.rsqrt(ems + eps)).astype(jnp.bfloat16)
    else:
        e = e_ref[...]  # already RMS-normalized bf16

    o_ref[...] = lax.dot_general(
        xn_ref[...], e,
        dimension_numbers=(((1,), (1,)), ((), ())),
        preferred_element_type=jnp.float32,
    ).astype(o_ref.dtype)


# --------------------------------------------------------------------------
# Wrapper
# --------------------------------------------------------------------------

def output_layer(x: jax.Array,
                 embedding: jax.Array,
                 w_embed: jax.Array,
                 w_final: jax.Array,
                 model: int = 0,
                 eps: float = 1e-6,
                 out_dtype=None) -> jax.Array:
    """Fused OutputLayer.forwardTensor: two RMSNorms + logits projection."""
    d = x.shape[-1]
    skip = model * d

    # Parameter glue (plain JAX, negligible).
    emb = embedding[:, skip:skip + d]                       # (V, d)
    wf = w_final[skip:skip + d].astype(jnp.float32)         # final_norm splice
    we = w_embed[:d].astype(jnp.float32)                    # embedding_norm (model=0)
    # Both per-feature scales act along the contracted axis -> fold into one
    # and apply it only to the (much smaller) x operand.
    scale = (1.0 + wf) * (1.0 + we)

    lead_shape = x.shape[:-1]
    x2d = x.reshape(-1, d)
    n_rows, V = x2d.shape[0], emb.shape[0]

    # Pad the contraction dim to a 128-lane multiple. Zero padding is exact:
    # mean-of-squares uses 1/d_true and padded features contribute nothing.
    d_pad = _round_up(max(d, 128), 128)
    if d_pad != d:
        x2d = jnp.pad(x2d, ((0, 0), (0, d_pad - d)))
        emb = jnp.pad(emb, ((0, 0), (0, d_pad - d)))
        scale = jnp.pad(scale, (0, d_pad - d))
    scale2d = scale.reshape(1, d_pad)

    if out_dtype is None:
        out_dtype = jnp.promote_types(x.dtype, jnp.float32)  # torch promotion
    out_itemsize = jnp.dtype(out_dtype).itemsize
    inv_d = 1.0 / float(d)

    # Generation-aware VMEM budget.
    vmem_cap = _vmem_capacity_bytes()                 # 128 MiB v5e/v6e, 64 MiB v7x
    budget = int(vmem_cap * 0.75)                     # ~96 / ~48 MiB
    limit_cap = max(32 << 20, vmem_cap - (8 << 20))   # leave compiler headroom

    TM_CAP, TV_CAP = 512, 512                         # tv multiple of 128 -> lane-dense
    tm = n_rows if n_rows <= TM_CAP else TM_CAP
    tv = V if V <= TV_CAP else TV_CAP

    # Fuse the embedding norm into the matmul only when a single row tile covers
    # all rows (each embedding tile is then normalized exactly once anyway).
    fused = n_rows <= TM_CAP
    emb_item = emb.dtype.itemsize if fused else 2     # two-pass streams bf16

    def vmem_est(tm_, tv_):
        pipeline = 2 * (tm_ * d_pad * x2d.dtype.itemsize
                        + tv_ * d_pad * emb_item
                        + tm_ * tv_ * out_itemsize
                        + d_pad * 4)
        scratch = tm_ * d_pad * 2                     # bf16 x-norm cache
        temps = 3 * tm_ * d_pad * 4                   # f32 x-norm intermediates
        if fused:
            temps += 3 * tv_ * d_pad * 4              # f32 e-norm intermediates
        return pipeline + scratch + temps

    # Shrink only capped dims (keeps (8,128)/full-dim block rules intact).
    while vmem_est(tm, tv) > budget:
        if tv > 128 and tv < V:
            tv //= 2
        elif tm > 8 and tm < n_rows:
            tm //= 2
        else:
            break

    # ---- pass 1: pre-normalize the embedding when it will be re-streamed ----
    if not fused:
        tvn = V if V <= 512 else 512

        def pre_est(tvn_):
            return (2 * tvn_ * d_pad * (emb.dtype.itemsize + 2)
                    + 2 * tvn_ * d_pad * 4)

        while pre_est(tvn) > budget and tvn > 8 and tvn < V:
            tvn //= 2

        emb_in = pl.pallas_call(
            functools.partial(_embed_norm_kernel, eps=eps, inv_d=inv_d),
            out_shape=jax.ShapeDtypeStruct((V, d_pad), jnp.bfloat16),
            grid_spec=pltpu.PrefetchScalarGridSpec(
                num_scalar_prefetch=0,
                grid=(pl.cdiv(V, tvn),),
                in_specs=[pl.BlockSpec((tvn, d_pad), lambda i: (i, 0))],
                out_specs=pl.BlockSpec((tvn, d_pad), lambda i: (i, 0)),
            ),
            compiler_params=pltpu.CompilerParams(
                dimension_semantics=("parallel",),
                vmem_limit_bytes=int(min(max(pre_est(tvn) * 1.5, 32 << 20),
                                         limit_cap)),
            ),
        )(emb)
    else:
        emb_in = emb

    # ---- pass 2: (x-norm hoisted) + bf16 tiled matmul ------------------------
    grid = (pl.cdiv(n_rows, tm), pl.cdiv(V, tv))
    vmem_limit = int(min(max(vmem_est(tm, tv) * 1.5, 32 << 20), limit_cap))

    kernel = functools.partial(_logits_kernel, eps=eps, inv_d=inv_d,
                               normalize_emb=fused)

    out2d = pl.pallas_call(
        kernel,
        out_shape=jax.ShapeDtypeStruct((n_rows, V), out_dtype),
        grid_spec=pltpu.PrefetchScalarGridSpec(
            num_scalar_prefetch=0,
            grid=grid,
            in_specs=[
                pl.BlockSpec((tm, d_pad), lambda i, j: (i, 0)),   # x tile
                pl.BlockSpec((1, d_pad), lambda i, j: (0, 0)),    # combined scale
                pl.BlockSpec((tv, d_pad), lambda i, j: (j, 0)),   # embedding tile
            ],
            out_specs=pl.BlockSpec((tm, tv), lambda i, j: (i, j)),
            scratch_shapes=[pltpu.VMEM((tm, d_pad), jnp.bfloat16)],
        ),
        compiler_params=pltpu.CompilerParams(
            # Rows "parallel" (v7x 2-TC sharding); vocab must be "arbitrary"
            # because the x-norm is hoisted under pl.when(program_id(1) == 0).
            dimension_semantics=("parallel", "arbitrary"),
            vmem_limit_bytes=vmem_limit,
        ),
    )(x2d, scale2d, emb_in)

    return out2d.reshape(lead_shape + (V,))


# --------------------------------------------------------------------------
# Pure-JAX reference mirroring the PyTorch OutputLayer.forwardTensor
# --------------------------------------------------------------------------

def output_layer_ref(x, embedding, w_embed, w_final, model=0, eps=1e-6):
    def rmsnorm(v, w):
        v32 = v.astype(jnp.float32)
        n = (v32 * lax.rsqrt(jnp.mean(v32 * v32, axis=-1, keepdims=True) + eps)
             ).astype(v.dtype)
        return n * (1.0 + w.astype(jnp.float32))

    d = x.shape[-1]
    skip = model * d
    ne = rmsnorm(embedding[:, skip:skip + d], w_embed[:d])   # embedding_norm
    nx = rmsnorm(x, w_final[skip:skip + d])                  # final_norm(x, model)
    return jnp.einsum('...d,vd->...v', nx, ne,
                      preferred_element_type=jnp.float32,
                      precision=lax.Precision.HIGHEST)


if __name__ == "__main__":
    key = jax.random.PRNGKey(0)
    kx, ke, kwe, kwf, kx2 = jax.random.split(key, 5)

    # ---- case 1: small, single row tile (fully fused path) -----------------
    batch, seq, hidden = 2, 8, 32
    full_dim = 2 * hidden         # parent-model hidden size (weight/embedding width)
    vocab = 64
    model_idx = 1                 # exercises weight + embedding splicing

    x = jax.random.normal(kx, (batch, seq, hidden), dtype=jnp.float32)
    embedding = jax.random.normal(ke, (vocab, full_dim), dtype=jnp.float32)
    w_embed = 0.01 * jax.random.normal(kwe, (full_dim,), dtype=jnp.float32)
    w_final = 0.01 * jax.random.normal(kwf, (full_dim,), dtype=jnp.float32)

    logits = jax.block_until_ready(
        output_layer(x, embedding, w_embed, w_final, model=model_idx))
    ref = output_layer_ref(x, embedding, w_embed, w_final, model=model_idx)
    assert logits.shape == (batch, seq, vocab), logits.shape
    rel = jnp.linalg.norm(logits - ref) / (jnp.linalg.norm(ref) + 1e-12)
    assert rel < 2e-2, f"fused path mismatch: rel_err={rel}"

    # ---- case 2: >512 rows -> pre-normalized embedding + hoisted x-norm ----
    x_big = jax.random.normal(kx2, (1, 520, hidden), dtype=jnp.float32)
    logits_big = jax.block_until_ready(
        output_layer(x_big, embedding, w_embed, w_final, model=model_idx))
    ref_big = output_layer_ref(x_big, embedding, w_embed, w_final, model=model_idx)
    assert logits_big.shape == (1, 520, vocab), logits_big.shape
    rel_big = jnp.linalg.norm(logits_big - ref_big) / (jnp.linalg.norm(ref_big) + 1e-12)
    assert rel_big < 2e-2, f"two-pass path mismatch: rel_err={rel_big}"

    print("KERNEL_OK")
</pallas_src>

<mosaic_0001>
module attributes {stable_mosaic.version = 11 : i64} {
  func.func @_logits_kernel(%arg0: i32, %arg1: i32, %arg2: memref<16x128xf32, #tpu.memory_space<vmem>>, %arg3: memref<1x128xf32, #tpu.memory_space<vmem>>, %arg4: memref<64x128xf32, #tpu.memory_space<vmem>>, %arg5: memref<16x64xf32, #tpu.memory_space<vmem>>, %arg6: memref<16x128xbf16, #tpu.memory_space<vmem>>) attributes {dimension_semantics = [#tpu.dimension_semantics<parallel>, #tpu.dimension_semantics<arbitrary>], iteration_bounds = array<i64: 1, 1>, scalar_prefetch = 0 : i64, scratch_operands = 1 : i64, tpu.core_type = #tpu.core_type<tc>, window_params = [{transform_indices = @transform_0, window_bounds = array<i64: 16, 128>}, {pipeline_mode = #tpu.pipeline_mode<synchronous>, transform_indices = @transform_1, window_bounds = array<i64: 1, 128>}, {transform_indices = @transform_2, window_bounds = array<i64: 64, 128>}, {transform_indices = @transform_3, window_bounds = array<i64: 16, 64>}]} {
    %c0_i32 = arith.constant 0 : i32
    %0 = arith.cmpi eq, %arg1, %c0_i32 : i32
    %1 = arith.extui %0 : i1 to i32
    %c0_i32_0 = arith.constant 0 : i32
    %2 = arith.cmpi ne, %1, %c0_i32_0 : i32
    scf.if %2 {
      %c0_9 = arith.constant 0 : index
      %c0_10 = arith.constant 0 : index
      %18 = vector.load %arg2[%c0_9, %c0_10] : memref<16x128xf32, #tpu.memory_space<vmem>>, vector<16x128xf32>
      %19 = arith.mulf %18, %18 : vector<16x128xf32>
      %cst_11 = arith.constant dense<0.000000e+00> : vector<16xf32>
      %20 = vector.multi_reduction <add>, %19, %cst_11 [1] : vector<16x128xf32> to vector<16xf32>
      %21 = vector.shape_cast %20 : vector<16xf32> to vector<16x1xf32>
      %cst_12 = arith.constant 3.125000e-02 : f32
      %22 = vector.broadcast %cst_12 : f32 to vector<16x1xf32>
      %23 = arith.mulf %21, %22 : vector<16x1xf32>
      %cst_13 = arith.constant 9.99999997E-7 : f32
      %24 = vector.broadcast %cst_13 : f32 to vector<16x1xf32>
      %25 = arith.addf %23, %24 : vector<16x1xf32>
      %26 = math.rsqrt %25 : vector<16x1xf32>
      %27 = vector.broadcast %26 : vector<16x1xf32> to vector<16x128xf32>
      %28 = arith.mulf %18, %27 : vector<16x128xf32>
      %c0_14 = arith.constant 0 : index
      %c0_15 = arith.constant 0 : index
      %29 = vector.load %arg3[%c0_14, %c0_15] : memref<1x128xf32, #tpu.memory_space<vmem>>, vector<1x128xf32>
      %30 = vector.broadcast %29 : vector<1x128xf32> to vector<16x128xf32>
      %31 = arith.mulf %28, %30 : vector<16x128xf32>
      %32 = arith.truncf %31 : vector<16x128xf32> to vector<16x128xbf16>
      %c0_16 = arith.constant 0 : index
      %c0_17 = arith.constant 0 : index
      %33 = vector.load %arg6[%c0_16, %c0_17] : memref<16x128xbf16, #tpu.memory_space<vmem>>, vector<16x128xbf16>
      tpu.vector_store %arg6[%c0_16, %c0_17], %32 {strides = array<i32>} : memref<16x128xbf16, #tpu.memory_space<vmem>>, vector<16x128xbf16>,
    } else {
    }
    %c0 = arith.constant 0 : index
    %c0_1 = arith.constant 0 : index
    %3 = vector.load %arg4[%c0, %c0_1] : memref<64x128xf32, #tpu.memory_space<vmem>>, vector<64x128xf32>
    %4 = arith.mulf %3, %3 : vector<64x128xf32>
    %cst = arith.constant dense<0.000000e+00> : vector<64xf32>
    %5 = vector.multi_reduction <add>, %4, %cst [1] : vector<64x128xf32> to vector<64xf32>
    %6 = vector.shape_cast %5 : vector<64xf32> to vector<64x1xf32>
    %cst_2 = arith.constant 3.125000e-02 : f32
    %7 = vector.broadcast %cst_2 : f32 to vector<64x1xf32>
    %8 = arith.mulf %6, %7 : vector<64x1xf32>
    %cst_3 = arith.constant 9.99999997E-7 : f32
    %9 = vector.broadcast %cst_3 : f32 to vector<64x1xf32>
    %10 = arith.addf %8, %9 : vector<64x1xf32>
    %11 = math.rsqrt %10 : vector<64x1xf32>
    %12 = vector.broadcast %11 : vector<64x1xf32> to vector<64x128xf32>
    %13 = arith.mulf %3, %12 : vector<64x128xf32>
    %14 = arith.truncf %13 : vector<64x128xf32> to vector<64x128xbf16>
    %c0_4 = arith.constant 0 : index
    %c0_5 = arith.constant 0 : index
    %15 = vector.load %arg6[%c0_4, %c0_5] : memref<16x128xbf16, #tpu.memory_space<vmem>>, vector<16x128xbf16>
    %cst_6 = arith.constant dense<0.000000e+00> : vector<16x64xf32>
    %16 = tpu.matmul %15, %14, %cst_6 {dimension_numbers = #tpu.dot_dimension_numbers<[1], [1], [0], [0], [0, 0, 1, 0], [], []>} : vector<16x128xbf16>, vector<64x128xbf16>, vector<16x64xf32> -> vector<16x64xf32>
    %c0_7 = arith.constant 0 : index
    %c0_8 = arith.constant 0 : index
    %17 = vector.load %arg5[%c0_7, %c0_8] : memref<16x64xf32, #tpu.memory_space<vmem>>, vector<16x64xf32>
    tpu.vector_store %arg5[%c0_7, %c0_8], %16 {strides = array<i32>} : memref<16x64xf32, #tpu.memory_space<vmem>>, vector<16x64xf32>,
    return
  }
  func.func @transform_0(%arg0: i32, %arg1: i32) -> (i32, i32) {
    %c0_i32 = arith.constant 0 : i32
    %c0_i32_0 = arith.constant 0 : i32
    return %arg0, %c0_i32 : i32, i32
  }
  func.func @transform_1(%arg0: i32, %arg1: i32) -> (i32, i32) {
    %c0_i32 = arith.constant 0 : i32
    %c0_i32_0 = arith.constant 0 : i32
    %c0_i32_1 = arith.constant 0 : i32
    return %c0_i32, %c0_i32_0 : i32, i32
  }
  func.func @transform_2(%arg0: i32, %arg1: i32) -> (i32, i32) {
    %c0_i32 = arith.constant 0 : i32
    %c0_i32_0 = arith.constant 0 : i32
    return %arg1, %c0_i32 : i32, i32
  }
  func.func @transform_3(%arg0: i32, %arg1: i32) -> (i32, i32) {
    %c0_i32 = arith.constant 0 : i32
    return %arg0, %arg1 : i32, i32
  }
}

</mosaic_0001>

<bundles_post_ra>
// kernel: tpu_custom_call.1
= control target key start
LH: loop header
LB: loop body
LE: loop exit
PB: predicated region body
PF: predicated region fallthrough
CT: control target
= control target key end

     0   :  { %8 = vsyncpa [#allocation4], 0  ;;  %s453_s0 = inlined_call_operand.hbm [shape: f32[16,128], index: 0, kind: input, shape index: {}]   ;;  %s454_s1 = inlined_call_operand.vmem [shape: f32[1,128], index: 1, kind: input, shape index: {}]   ;;  %s455_s2 = inlined_call_operand.hbm [shape: f32[64,128], index: 2, kind: input, shape index: {}]   ;;  %s456_s3 = inlined_call_operand.hbm [shape: f32[16,64], index: 3, kind: output, shape index: {}]  }
   0x1   :  { %9 = vsyncpa [#allocation7], 0 }
   0x2   :  { %10 = vsyncpa [#allocation5], 0  ;;  %s323_s12 = smov [#allocation3]   ;;  %s251_s16 = scalar_lea.hbm %s453_s0, 256 }
   0x3   :  { %s16_s13 = sshll.u32 %s323_s12, 4  ;;  %p252_p0 = scmp.ne.s32.totalorder %s453_s0, %s251_s16  ;;  %s17_s13 = int_to_ptr.vmem [resolvable:$true] %s16_s13 }
   0x4   :  { %p255_p1 = scmp.lt.u32.totalorder %s251_s16, %s453_s0 }
   0x6   :  { %p257_p2 = pnand %p255_p1, %p252_p0 }
   0x8   :  { %260 = shalt.err (!%p257_p2)
}
   0x9   :  { %s261_s21 = scalar_lea.vmem %s17_s13, 256  ;;  %p266_p4 = scmp.lt.s32.totalorder %s17_s13, %s17_s13 }
   0xa   :  { %p262_p3 = scmp.ne.s32.totalorder %s17_s13, %s261_s21  ;;  %p267_p5 = scmp.lt.s32.totalorder %s261_s21, %s261_s21 }
   0xc   :  { %p268_p6 = por %p267_p5, %p266_p4 }
   0xe   :  { %p269_p7 = pnand %p268_p6, %p262_p3 }
  0x10   :  { %272 = shalt.err (!%p269_p7)
}
  0x11   :  { %s324_s22 = smov 128   ;;  %s325_s23 = smov 8  }
  0x12   :  { %22 = dma.hbm_to_vmem [thread:$0]  %s453_s0, 256, %s17_s13, [#allocation4], %s324_s22, %s324_s22, %s325_s23  }
  0x13   :  { %s326_s26 = smov [#allocation6]   ;;  %s273_s30 = scalar_lea.hbm %s455_s2, 1024 }
  0x14   :  { %s30_s27 = sshll.u32 %s326_s26, 4  ;;  %p274_p8 = scmp.ne.s32.totalorder %s455_s2, %s273_s30  ;;  %s31_s27 = int_to_ptr.vmem [resolvable:$true] %s30_s27 }
  0x15   :  { %p277_p9 = scmp.lt.u32.totalorder %s273_s30, %s455_s2 }
  0x17   :  { %p279_p10 = pnand %p277_p9, %p274_p8 }
  0x19   :  { %282 = shalt.err (!%p279_p10)
}
  0x1a   :  { %s283_s8 = scalar_lea.vmem %s31_s27, 1024  ;;  %p288_p12 = scmp.lt.s32.totalorder %s31_s27, %s31_s27 }
  0x1b   :  { %p284_p11 = scmp.ne.s32.totalorder %s31_s27, %s283_s8  ;;  %p289_p13 = scmp.lt.s32.totalorder %s283_s8, %s283_s8 }
  0x1d   :  { %p290_p0 = por %p289_p13, %p288_p12 }
  0x1f   :  { %p291_p1 = pnand %p290_p0, %p284_p11 }
  0x21   :  { %294 = shalt.err (!%p291_p1)
}
  0x22   :  { %36 = dma.hbm_to_vmem [thread:$0]  %s455_s2, 1024, %s31_s27, [#allocation7], %s324_s22, %s324_s22, %s325_s23  }
  0x23   :  { %317 = dma.done.wait [#allocation4], 256  }
  0x24   :  { %318 = vsyncadd [#allocation4], 4294967040 }
  0x25   :  { %319 = dma.done.wait [#allocation7], 1024  }
  0x26   :  { %320 = vsyncadd [#allocation7], 4294966272  ;;  %v380_v0 = vld [vmem:[#allocation6] sm:$0xff]  ;;  %v382_v1 = vld [vmem:[#allocation6 + $0x10] sm:$0xff]  ;;  %v327_v20 = vmov 0.0   ;;  %vm328_vm0 = vmmov 0  }
  0x27   :  { %v384_v2 = vld [vmem:[#allocation6 + $0x8] sm:$0xff]  ;;  %v83_v3 = vmul.f32 %v380_v0, %v380_v0  ;;  %v85_v4 = vmul.f32 %v382_v1, %v382_v1  ;;  %v390_v5 = vld [vmem:[#allocation6 + $0x18] sm:$0xff]  ;;  %v398_v9 = vld [vmem:[#allocation6 + $0x20] sm:$0xff]  ;;  %212 = vmatprep.subr.bf16.mxu0 %v327_v20  ;;  %220 = vmatprep.mubr.msk.bf16.mxu0 %vm328_vm0, %v327_v20  ;;  %vm185_vm1 = vcmask 523264   ;;  %s329_s11 = smov [#allocation8]  }
  0x28   :  { %v84_v6 = vmul.f32 %v384_v2, %v384_v2  ;;  %v86_v7 = vmul.f32 %v390_v5, %v390_v5  ;;  %v396_v8 = vld [vmem:[#allocation6 + $0x28] sm:$0xff]  ;;  %v87_v11 = vmul.f32 %v398_v9, %v398_v9  ;;  %v404_v12 = vld [vmem:[#allocation6 + $0x38] sm:$0xff]  ;;  %v406_v13 = vld [vmem:[#allocation6 + $0x30] sm:$0xff]  ;;  %s193_s12 = sshll.u32 %s329_s11, 4  ;;  %s194_s12 = int_to_ptr.vmem [resolvable:$true] %s193_s12 }
  0x29   :  { %91 = vadd.xlane.f32.xlu0 %v83_v3  ;;  %95 = vadd.xlane.f32.xlu1 %v85_v4  ;;  %v88_v10 = vmul.f32 %v396_v8, %v396_v8  ;;  %v90_v14 = vmul.f32 %v404_v12, %v404_v12  ;;  %v89_v15 = vmul.f32 %v406_v13, %v406_v13  ;;  %v412_v16 = vld [vmem:[#allocation3 + $0x8] sm:$0xff]  ;;  %v414_v17 = vld [vmem:[#allocation3] sm:$0xff]  ;;  %s295_s13 = scalar_lea.vmem %s194_s12, 256  ;;  %p300_p3 = scmp.lt.s32.totalorder %s194_s12, %s194_s12 }
  0x2a   :  { %v51_v18 = vmul.f32 %v412_v16, %v412_v16  ;;  %v50_v19 = vmul.f32 %v414_v17, %v414_v17  ;;  %p296_p2 = scmp.ne.s32.totalorder %s194_s12, %s295_s13  ;;  %p301_p4 = scmp.lt.s32.totalorder %s295_s13, %s295_s13 }
  0x2c   :  { %p302_p5 = por %p301_p4, %p300_p3 }
  0x2d   :  { %93 = vadd.xlane.f32.xlu0 %v84_v6  ;;  %97 = vadd.xlane.f32.xlu1 %v86_v7 }
  0x2e   :  { %p303_p6 = pnand %p302_p5, %p296_p2 }
  0x31   :  { %101 = vadd.xlane.f32.xlu1 %v88_v10  ;;  %99 = vadd.xlane.f32.xlu0 %v87_v11 }
  0x35   :  { %105 = vadd.xlane.f32.xlu1 %v90_v14  ;;  %103 = vadd.xlane.f32.xlu0 %v89_v15 }
  0x39   :  { %54 = vadd.xlane.f32.xlu1 %v51_v18  ;;  %52 = vadd.xlane.f32.xlu0 %v50_v19 }
  0xb6   :  { %v92_v21 = vpop.xlane.xlu0 %91  ;;  %v96_v22 = vpop.xlane.xlu1 %95 }
  0xb7   :  { %v107_v23 = vmul.f32 0.03125, %v92_v21  ;;  %v109_v25 = vmul.f32 0.03125, %v96_v22 }
  0xb9   :  { %v115_v24 = vadd.f32 1e-06, %v107_v23  ;;  %v117_v31 = vadd.f32 1e-06, %v109_v25 }
  0xba   :  { %v94_v26 = vpop.xlane.xlu0 %93  ;;  %v98_v27 = vpop.xlane.xlu1 %97 }
  0xbb   :  { %v108_v28 = vmul.f32 0.03125, %v94_v26  ;;  %v110_v29 = vmul.f32 0.03125, %v98_v27  ;;  %231 = vrsqrt.f32 %v115_v24 }
  0xbd   :  { %v116_v30 = vadd.f32 1e-06, %v108_v28  ;;  %v118_v34 = vadd.f32 1e-06, %v110_v29 }
  0xbe   :  { %v102_v32 = vpop.xlane.xlu1 %101  ;;  %v100_v33 = vpop.xlane.xlu0 %99 }
  0xbf   :  { %233 = vrsqrt.f32 %v116_v30  ;;  %v112_v35 = vmul.f32 0.03125, %v102_v32  ;;  %v111_v36 = vmul.f32 0.03125, %v100_v33 }
  0xc0   :  { %235 = vrsqrt.f32 %v117_v31 }
  0xc1   :  { %237 = vrsqrt.f32 %v118_v34  ;;  %v120_v39 = vadd.f32 1e-06, %v112_v35  ;;  %v119_v40 = vadd.f32 1e-06, %v111_v36 }
  0xc2   :  { %v106_v37 = vpop.xlane.xlu1 %105  ;;  %v104_v38 = vpop.xlane.xlu0 %103 }
  0xc3   :  { %239 = vrsqrt.f32 %v120_v39  ;;  %v114_v42 = vmul.f32 0.03125, %v106_v37  ;;  %v113_v45 = vmul.f32 0.03125, %v104_v38 }
  0xc4   :  { %241 = vrsqrt.f32 %v119_v40 }
  0xc5   :  { %v232_v41 = vpop.eup %231  ;;  %v122_v52 = vadd.f32 1e-06, %v114_v42  ;;  %v121_v55 = vadd.f32 1e-06, %v113_v45 }
  0xc6   :  { %v55_v43 = vpop.xlane.xlu1 %54  ;;  %v53_v46 = vpop.xlane.xlu0 %52  ;;  %v131_v47 = vmul.f32 %v232_v41, %v380_v0 }
  0xc7   :  { %v57_v49 = vmul.f32 0.03125, %v55_v43  ;;  %v56_v53 = vmul.f32 0.03125, %v53_v46  ;;  %243 = vrsqrt.f32 %v122_v52 }
  0xc8   :  { %245 = vrsqrt.f32 %v121_v55 }
  0xc9   :  { %v234_v44 = vpop.eup %233  ;;  %v59_v56 = vadd.f32 1e-06, %v57_v49  ;;  %v58_v59 = vadd.f32 1e-06, %v56_v53 }
  0xca   :  { %v132_v48 = vmul.f32 %v234_v44, %v384_v2  ;;  %v236_v50 = vpop.eup %235 }
  0xcb   :  { %v238_v54 = vpop.eup %237  ;;  %v133_v57 = vmul.f32 %v236_v50, %v382_v1  ;;  %247 = vrsqrt.f32 %v59_v56 }
  0xcc   :  { %v139_v51 = vpack.c.bf16 %v132_v48, %v131_v47  ;;  %v134_v58 = vmul.f32 %v238_v54, %v390_v5  ;;  %249 = vrsqrt.f32 %v58_v59 }
  0xcd   :  { %v240_v60 = vpop.eup %239 }
  0xce   :  { %213 = vmatpush3.bf16.xpose.msra.mxu0 %v139_v51  ;;  %v242_v61 = vpop.eup %241  ;;  %v140_v62 = vpack.c.bf16 %v134_v58, %v133_v57  ;;  %v136_v0 = vmul.f32 %v240_v60, %v396_v8  ;;  %v206_v8 = vld [vmem:[%s454_s1] ss:$0 sm:$0xff] }
  0xcf   :  { %214 = vmatprep.subr.bf16.mxu0 %v327_v20  ;;  %v135_v63 = vmul.f32 %v242_v61, %v398_v9 }
  0xd1   :  { %v244_v2 = vpop.eup %243  ;;  %v141_v3 = vpack.c.bf16 %v136_v0, %v135_v63 }
  0xd2   :  { %v246_v4 = vpop.eup %245  ;;  %v138_v7 = vmul.f32 %v244_v2, %v404_v12 }
  0xd3   :  { %v137_v5 = vmul.f32 %v246_v4, %v406_v13 }
  0xd5   :  { %v248_v1 = vpop.eup %247  ;;  %v142_v11 = vpack.c.bf16 %v138_v7, %v137_v5 }
  0xd6   :  { %215 = vmatpush3.bf16.xpose.msra.mxu0 %v140_v62  ;;  %v250_v6 = vpop.eup %249  ;;  %v63_v9 = vmul.f32 %v248_v1, %v412_v16 }
  0xd7   :  { %216 = vmatprep.subr.bf16.mxu0 %v327_v20  ;;  %v62_v10 = vmul.f32 %v250_v6, %v414_v17 }
  0xd8   :  { %v72_v15 = vmul.f32 %v206_v8, %v63_v9 }
  0xd9   :  { %v71_v14 = vmul.f32 %v206_v8, %v62_v10 }
  0xdb   :  { %v73_v18 = vpack.c.bf16 %v72_v15, %v71_v14 }
  0xde   :  { %217 = vmatpush3.bf16.xpose.msra.mxu0 %v141_v3 }
  0xdf   :  { %218 = vmatprep.subr.bf16.mxu0 %v327_v20 }
  0xe6   :  { %219 = vmatpush3.bf16.xpose.msra.mxu0 %v142_v11 }
  0xed   :  { %221 = vmatmul.mubr.bf16.vlgmr.msra.gmra.mrb[0].mxu0 %v73_v18 }
 0x1c0   :  { %v178_v12 = vpop.f32.mrb[0].mxu0 }
 0x1c1   :  { %186 = vst.msk [vmem:[#allocation8] sm:$0xff] %vm185_vm1, %v178_v12  ;;  %v222_v13 = vpop.f32.mrb[1].mxu0 }
 0x1c2   :  { %v181_v17 = vpop.f32.mrb[2].mxu0 }
 0x1c3   :  { %187 = vst.msk [vmem:[#allocation8 + $0x8] sm:$0xff] %vm185_vm1, %v181_v17  ;;  %v223_v16 = vpop.f32.mrb[3].mxu0 }
 0x1c4   :  { %306 = shalt.err (!%p303_p6)
}
 0x1c5   :  { %s307_s15 = scalar_lea.hbm %s456_s3, 256 }
 0x1c6   :  { %p308_p7 = scmp.ne.s32.totalorder %s456_s3, %s307_s15  ;;  %p311_p8 = scmp.lt.u32.totalorder %s307_s15, %s456_s3 }
 0x1c8   :  { %p313_p9 = pnand %p311_p8, %p308_p7 }
 0x1ca   :  { %316 = shalt.err (!%p313_p9)
}
 0x1cb   :  { %199 = dma.vmem_to_hbm [thread:$0]  %s194_s12, 256, %s456_s3, [#allocation5], %s324_s22, %s324_s22, %s325_s23  }
 0x1cc   :  { %321 = dma.done.wait [#allocation5], 256  }
 0x1cd   :  { %322 = vsyncadd [#allocation5], 4294967040 }
 0x1ce   :  { %203 = vsyncpa [#allocation4], 1 }
 0x1cf   :  { %204 = vsyncpa [#allocation7], 1 }
 0x1d0   :  { %205 = vsyncpa [#allocation5], 1 }

</bundles_post_ra>
